<compile_context>
chip_gen: v6e
topology: v6e:2x2x1
jax: 0.10.0
libtpu: 0.0.40
codegen_flags: <defaults>
</compile_context>

<pallas_src>
import functools

import jax
import jax.numpy as jnp
from jax.experimental import pallas as pl
from jax.experimental.pallas import tpu as pltpu


def _tree_sum(parts):
    """Balanced pairwise sum: log-depth dependency chain instead of linear."""
    while len(parts) > 1:
        nxt = [parts[i] + parts[i + 1] for i in range(0, len(parts) - 1, 2)]
        if len(parts) % 2:
            nxt.append(parts[-1])
        parts = nxt
    return parts[0]


def _moving_avg_kernel(x_ref, mean_ref, *, kernel_size: int):
    # Block is (L, T): full sequence on the sublane axis, lane-dense tile of
    # fused (batch*channel) columns on the 128-wide lane axis.
    xf = x_ref[...].astype(jnp.float32)          # read + cast exactly once
    L, T = xf.shape
    front = (kernel_size - 1) // 2
    end = kernel_size - 1 - front

    # One edge-replicated padded buffer (built once, not per tap).
    parts = []
    if front > 0:
        parts.append(jnp.broadcast_to(xf[0:1, :], (front, T)))
    parts.append(xf)
    if end > 0:
        parts.append(jnp.broadcast_to(xf[L - 1:L, :], (end, T)))
    xp = jnp.concatenate(parts, axis=0) if len(parts) > 1 else xf  # (L+k-1, T)

    # kernel_size static-offset slices of the padded buffer, f32 tree-sum.
    # (After the lane-dense re-layout this kernel is HBM-bound, so the tap sum
    # is essentially free filler on the VPU; the tree shape just keeps the add
    # chain short so it packs cleanly into the VLIW bundles.)
    taps = [xp[j:j + L, :] for j in range(kernel_size)]
    acc = _tree_sum(taps)

    mean_ref[...] = (acc * (1.0 / kernel_size)).astype(mean_ref.dtype)


def _choose_lane_tile(L: int, n_lanes: int, itemsize: int,
                      target_bytes: int = 1 << 20) -> int:
    """Pick a 128-multiple lane tile giving ~target_bytes input blocks.

    Small enough that 2x double-buffered in + 2x out + f32 temporaries fit the
    default scoped VMEM on every chip (incl. v7x's 64 MiB physical)."""
    t = (target_bytes // max(1, L * itemsize)) // 128 * 128
    t = max(128, min(t, n_lanes))
    while n_lanes % t:
        t -= 128
    return t


def moving_avg(x: jax.Array, kernel_size: int, stride: int = 1) -> jax.Array:
    """Matches the PyTorch moving_avg.forward on (B, L, C) input."""
    assert kernel_size >= 1
    B, L, C = x.shape
    N = B * C

    # Lane-dense re-layout: rows = sequence position, columns = fused (b, c).
    x2 = jnp.transpose(x, (1, 0, 2)).reshape(L, N)
    n_lanes = -(-N // 128) * 128
    if n_lanes != N:
        x2 = jnp.pad(x2, ((0, 0), (0, n_lanes - N)))

    T = _choose_lane_tile(L, n_lanes, jnp.dtype(x.dtype).itemsize)
    grid = (n_lanes // T,)

    mean2 = pl.pallas_call(
        functools.partial(_moving_avg_kernel, kernel_size=kernel_size),
        out_shape=jax.ShapeDtypeStruct((L, n_lanes), x.dtype),
        grid=grid,
        in_specs=[pl.BlockSpec((L, T), lambda j: (0, j))],
        out_specs=pl.BlockSpec((L, T), lambda j: (0, j)),
        compiler_params=pltpu.CompilerParams(
            dimension_semantics=("parallel",),
            vmem_limit_bytes=32 * 1024 * 1024,
        ),
    )(x2)

    mean = jnp.transpose(mean2[:, :N].reshape(L, B, C), (1, 0, 2))  # (B, L, C)
    if stride != 1:
        # AvgPool1d(stride>1) over the padded sequence == the stride-1 result
        # subsampled at the window starts.
        mean = mean[:, ::stride, :]
    return mean


def _reference(x: jax.Array, kernel_size: int, stride: int = 1) -> jax.Array:
    """Pure-JAX reference mirroring the PyTorch forward exactly."""
    front_n = (kernel_size - 1) // 2
    end_n = kernel_size - 1 - front_n
    front = jnp.repeat(x[:, 0:1, :], front_n, axis=1)
    end = jnp.repeat(x[:, -1:, :], end_n, axis=1)
    xp = jnp.concatenate([front, x, end], axis=1)        # (B, L+k-1, C)
    L = x.shape[1]
    n_out = (L - 1) // stride + 1
    windows = [xp[:, t * stride: t * stride + kernel_size, :].mean(axis=1)
               for t in range(n_out)]
    return jnp.stack(windows, axis=1)


if __name__ == "__main__":
    key = jax.random.PRNGKey(0)
    B, L, C = 2, 32, 8
    x = jax.random.normal(key, (B, L, C), dtype=jnp.float32)

    # Odd kernel, stride 1 (the standard Autoformer series_decomp config).
    m1 = moving_avg(x, kernel_size=5, stride=1)
    # Even kernel + stride 2 (exercises asymmetric padding and subsampling).
    m2 = moving_avg(x, kernel_size=4, stride=2)
    # kernel_size=1 degenerate case (identity).
    m3 = moving_avg(x, kernel_size=1, stride=1)
    jax.block_until_ready((m1, m2, m3))

    r1 = _reference(x, 5, 1)
    r2 = _reference(x, 4, 2)
    assert m1.shape == r1.shape, f"shape mismatch {m1.shape} vs {r1.shape}"
    assert m2.shape == r2.shape, f"shape mismatch {m2.shape} vs {r2.shape}"
    assert jnp.allclose(m1, r1, atol=1e-5, rtol=1e-5), "mean mismatch (k=5,s=1)"
    assert jnp.allclose(m2, r2, atol=1e-5, rtol=1e-5), "mean mismatch (k=4,s=2)"
    assert jnp.allclose(m3, x, atol=1e-6, rtol=1e-6), "mean mismatch (k=1,s=1)"

    print("KERNEL_OK")
</pallas_src>

<mosaic_0001>
module attributes {stable_mosaic.version = 11 : i64} {
  func.func @_moving_avg_kernel(%arg0: i32, %arg1: memref<32x128xf32, #tpu.memory_space<vmem>>, %arg2: memref<32x128xf32, #tpu.memory_space<vmem>>) attributes {dimension_semantics = [#tpu.dimension_semantics<parallel>], iteration_bounds = array<i64: 1>, scalar_prefetch = 0 : i64, scratch_operands = 0 : i64, tpu.core_type = #tpu.core_type<tc>, window_params = [{transform_indices = @transform_0, window_bounds = array<i64: 32, 128>}, {transform_indices = @transform_1, window_bounds = array<i64: 32, 128>}]} {
    %c0 = arith.constant 0 : index
    %c0_0 = arith.constant 0 : index
    %0 = vector.load %arg1[%c0, %c0_0] : memref<32x128xf32, #tpu.memory_space<vmem>>, vector<32x128xf32>
    %1 = vector.extract_strided_slice %0 {offsets = [0, 0], sizes = [1, 128], strides = [1, 1]} : vector<32x128xf32> to vector<1x128xf32>
    %2 = vector.shape_cast %1 : vector<1x128xf32> to vector<1x128xf32>
    %3 = vector.broadcast %2 : vector<1x128xf32> to vector<2x128xf32>
    %4 = vector.extract_strided_slice %0 {offsets = [31, 0], sizes = [1, 128], strides = [1, 1]} : vector<32x128xf32> to vector<1x128xf32>
    %5 = vector.shape_cast %4 : vector<1x128xf32> to vector<1x128xf32>
    %6 = vector.broadcast %5 : vector<1x128xf32> to vector<2x128xf32>
    %7 = tpu.concatenate %3, %0, %6 in 0 : vector<2x128xf32>, vector<32x128xf32>, vector<2x128xf32> -> vector<36x128xf32>
    %8 = vector.extract_strided_slice %7 {offsets = [0, 0], sizes = [32, 128], strides = [1, 1]} : vector<36x128xf32> to vector<32x128xf32>
    %9 = vector.extract_strided_slice %7 {offsets = [1, 0], sizes = [32, 128], strides = [1, 1]} : vector<36x128xf32> to vector<32x128xf32>
    %10 = vector.extract_strided_slice %7 {offsets = [2, 0], sizes = [32, 128], strides = [1, 1]} : vector<36x128xf32> to vector<32x128xf32>
    %11 = vector.extract_strided_slice %7 {offsets = [3, 0], sizes = [32, 128], strides = [1, 1]} : vector<36x128xf32> to vector<32x128xf32>
    %12 = vector.extract_strided_slice %7 {offsets = [4, 0], sizes = [32, 128], strides = [1, 1]} : vector<36x128xf32> to vector<32x128xf32>
    %13 = arith.addf %8, %9 : vector<32x128xf32>
    %14 = arith.addf %10, %11 : vector<32x128xf32>
    %15 = arith.addf %13, %14 : vector<32x128xf32>
    %16 = arith.addf %15, %12 : vector<32x128xf32>
    %cst = arith.constant 2.000000e-01 : f32
    %17 = vector.broadcast %cst : f32 to vector<32x128xf32>
    %18 = arith.mulf %16, %17 : vector<32x128xf32>
    %c0_1 = arith.constant 0 : index
    %c0_2 = arith.constant 0 : index
    %19 = vector.load %arg2[%c0_1, %c0_2] : memref<32x128xf32, #tpu.memory_space<vmem>>, vector<32x128xf32>
    tpu.vector_store %arg2[%c0_1, %c0_2], %18 {strides = array<i32>} : memref<32x128xf32, #tpu.memory_space<vmem>>, vector<32x128xf32>,
    return
  }
  func.func @transform_0(%arg0: i32) -> (i32, i32) {
    %c0_i32 = arith.constant 0 : i32
    %c0_i32_0 = arith.constant 0 : i32
    return %c0_i32, %arg0 : i32, i32
  }
  func.func @transform_1(%arg0: i32) -> (i32, i32) {
    %c0_i32 = arith.constant 0 : i32
    %c0_i32_0 = arith.constant 0 : i32
    return %c0_i32, %arg0 : i32, i32
  }
}

</mosaic_0001>

<bundles_post_ra>
// kernel: tpu_custom_call.1
= control target key start
LH: loop header
LB: loop body
LE: loop exit
PB: predicated region body
PF: predicated region fallthrough
CT: control target
= control target key end

     0   :  { %6 = vsyncpa [#allocation3], 0  ;;  %s233_s0 = inlined_call_operand.hbm [shape: f32[32,128], index: 0, kind: input, shape index: {}]   ;;  %s234_s1 = inlined_call_operand.hbm [shape: f32[32,128], index: 1, kind: output, shape index: {}]  }
   0x1   :  { %7 = vsyncpa [#allocation4], 0  ;;  %s190_s6 = smov [#allocation2]  }
   0x2   :  { %s13_s7 = sshll.u32 %s190_s6, 4  ;;  %s14_s7 = int_to_ptr.vmem [resolvable:$true] %s13_s7 }
   0x3   :  { %s154_s8 = scalar_lea.vmem %s14_s7, 512  ;;  %p159_p1 = scmp.lt.s32.totalorder %s14_s7, %s14_s7 }
   0x4   :  { %p155_p0 = scmp.ne.s32.totalorder %s14_s7, %s154_s8  ;;  %p160_p2 = scmp.lt.s32.totalorder %s154_s8, %s154_s8 }
   0x6   :  { %p161_p3 = por %p160_p2, %p159_p1 }
   0x8   :  { %p162_p4 = pnand %p161_p3, %p155_p0 }
   0xa   :  { %165 = shalt.err (!%p162_p4)
}
   0xb   :  { %s191_s9 = smov 128   ;;  %s192_s10 = smov 8  }
   0xc   :  { %19 = dma.hbm_to_vmem [thread:$0]  %s233_s0, 512, %s14_s7, [#allocation3], %s191_s9, %s191_s9, %s192_s10  }
   0xd   :  { %186 = dma.done.wait [#allocation3], 512  }
   0xe   :  { %187 = vsyncadd [#allocation3], 4294966784  ;;  %v27_v0 = vlaneseq  ;;  %v23_v4 = vld [vmem:[#allocation2] sm:$0xff]  ;;  %v24_v5 = vld [vmem:[#allocation2 + $0x8] sm:$0xff]  ;;  %vm39_vm0 = vcmask 1041408   ;;  %vm56_vm1 = vcmask 1046528  }
   0xf   :  { %v25_v6 = vld [vmem:[#allocation2 + $0x10] sm:$0xff]  ;;  %v26_v7 = vld [vmem:[#allocation2 + $0x18] sm:$0xff]  ;;  %v40_v9 = vrot.slane %v23_v4, 6  ;;  %v41_v10 = vrot.slane %v24_v5, 6  ;;  %vm81_vm2 = vcmask 1045504   ;;  %vm99_vm3 = vcmask 1043456  }
  0x10   :  { %v28_v1 = vshrl.u32 %v27_v0, 7  ;;  %v43_v11 = vrot.slane %v25_v6, 6  ;;  %v45_v13 = vrot.slane %v26_v7, 6  ;;  %s193_s0 = smov [#allocation5]  }
  0x11   :  { %v42_v14 = vsel %vm39_vm0, %v40_v9, %v41_v10  ;;  %s130_s13 = sshll.u32 %s193_s0, 4  ;;  %s131_s13 = int_to_ptr.vmem [resolvable:$true] %s130_s13 }
  0x12   :  { %v29_v2 = vsub.s32 0, %v28_v1  ;;  %v33_v3 = vsub.s32 7, %v28_v1  ;;  %v44_v15 = vsel %vm39_vm0, %v41_v10, %v43_v11  ;;  %v58_v18 = vrot.slane %v42_v14, 1  ;;  %s166_s14 = scalar_lea.vmem %s131_s13, 512  ;;  %p171_p6 = scmp.lt.s32.totalorder %s131_s13, %s131_s13 }
  0x13   :  { %v60_v19 = vrot.slane %v44_v15, 1  ;;  %v46_v21 = vsel %vm39_vm0, %v43_v11, %v45_v13  ;;  %v101_v29 = vrot.slane %v42_v14, 4  ;;  %v103_v30 = vrot.slane %v44_v15, 4  ;;  %p167_p5 = scmp.ne.s32.totalorder %s131_s13, %s166_s14  ;;  %p172_p7 = scmp.lt.s32.totalorder %s166_s14, %s166_s14 }
  0x14   :  { %v30_v8 = vrot.slane %v23_v4, %v29_v2  ;;  %v34_v12 = vrot.slane %v26_v7, %v33_v3  ;;  %v62_v25 = vrot.slane %v46_v21, 1  ;;  %v105_v33 = vrot.slane %v46_v21, 4 }
  0x15   :  { %v61_v24 = vsel %vm56_vm1, %v58_v18, %v60_v19  ;;  %v104_v46 = vsel %vm99_vm3, %v101_v29, %v103_v30  ;;  %p173_p8 = por %p172_p7, %p171_p6 }
  0x16   :  { %v52_v16 = vsel %vm39_vm0, %v30_v8, %v40_v9  ;;  %v53_v22 = vsel %vm39_vm0, %v45_v13, %v34_v12  ;;  %v71_v28 = vadd.f32 %v61_v24, %v42_v14  ;;  %v63_v31 = vsel %vm56_vm1, %v60_v19, %v62_v25 }
  0x17   :  { %v57_v17 = vrot.slane %v52_v16, 1  ;;  %v100_v20 = vrot.slane %v52_v16, 4  ;;  %v64_v26 = vrot.slane %v53_v22, 1  ;;  %v72_v37 = vadd.f32 %v63_v31, %v44_v15  ;;  %p174_p9 = pnand %p173_p8, %p167_p5 }
  0x18   :  { %v83_v36 = vrot.slane %v71_v28, 2  ;;  %v107_v40 = vrot.slane %v53_v22, 4  ;;  %v106_v47 = vsel %vm99_vm3, %v103_v30, %v105_v33 }
  0x19   :  { %v59_v23 = vsel %vm56_vm1, %v57_v17, %v58_v18  ;;  %v65_v32 = vsel %vm56_vm1, %v62_v25, %v64_v26  ;;  %v75_v34 = vadd.f32 %v64_v26, %v53_v22  ;;  %v102_v42 = vsel %vm99_vm3, %v100_v20, %v101_v29 }
  0x1a   :  { %v70_v27 = vadd.f32 %v59_v23, %v52_v16  ;;  %v73_v38 = vadd.f32 %v65_v32, %v46_v21  ;;  %v85_v43 = vrot.slane %v72_v37, 2  ;;  %v108_v51 = vsel %vm99_vm3, %v105_v33, %v107_v40 }
  0x1b   :  { %v89_v39 = vrot.slane %v75_v34, 2 }
  0x1c   :  { %v82_v35 = vrot.slane %v70_v27, 2  ;;  %v87_v44 = vrot.slane %v73_v38, 2  ;;  %v86_v48 = vsel %vm81_vm2, %v83_v36, %v85_v43 }
  0x1d   :  { %v96_v53 = vadd.f32 %v86_v48, %v71_v28 }
  0x1e   :  { %v84_v41 = vsel %vm81_vm2, %v82_v35, %v83_v36  ;;  %v88_v49 = vsel %vm81_vm2, %v85_v43, %v87_v44  ;;  %v90_v50 = vsel %vm81_vm2, %v87_v44, %v89_v39 }
  0x1f   :  { %v95_v45 = vadd.f32 %v84_v41, %v70_v27  ;;  %v97_v54 = vadd.f32 %v88_v49, %v72_v37  ;;  %v98_v55 = vadd.f32 %v90_v50, %v73_v38  ;;  %v114_v57 = vadd.f32 %v104_v46, %v96_v53 }
  0x21   :  { %v113_v52 = vadd.f32 %v102_v42, %v95_v45  ;;  %v115_v58 = vadd.f32 %v106_v47, %v97_v54  ;;  %v116_v59 = vadd.f32 %v108_v51, %v98_v55  ;;  %v118_v60 = vmul.f32 0.2, %v114_v57 }
  0x23   :  { %v117_v56 = vmul.f32 0.2, %v113_v52  ;;  %v119_v61 = vmul.f32 0.2, %v115_v58  ;;  %v120_v62 = vmul.f32 0.2, %v116_v59 }
  0x24   :  { %122 = vst [vmem:[#allocation5 + $0x8] sm:$0xff] %v118_v60 }
  0x25   :  { %121 = vst [vmem:[#allocation5] sm:$0xff] %v117_v56  ;;  %123 = vst [vmem:[#allocation5 + $0x10] sm:$0xff] %v119_v61 }
  0x26   :  { %124 = vst [vmem:[#allocation5 + $0x18] sm:$0xff] %v120_v62 }
  0x27   :  { %177 = shalt.err (!%p174_p9)
}
  0x28   :  { %136 = dma.vmem_to_hbm [thread:$0]  %s131_s13, 512, %s234_s1, [#allocation4], %s191_s9, %s191_s9, %s192_s10  }
  0x29   :  { %188 = dma.done.wait [#allocation4], 512  }
  0x2a   :  { %189 = vsyncadd [#allocation4], 4294966784 }
  0x2b   :  { %140 = vsyncpa [#allocation3], 1 }
  0x2c   :  { %141 = vsyncpa [#allocation4], 1 }

</bundles_post_ra>
